<compile_context>
chip_gen: v6e
topology: v6e:2x2x1
jax: 0.10.0
libtpu: 0.0.40
codegen_flags: <defaults>
</compile_context>

<pallas_src>
import jax
import jax.numpy as jnp
import numpy as np
from jax.experimental import pallas as pl
from jax.experimental.pallas import tpu as pltpu


def _round_up(x, m):
    return ((x + m - 1) // m) * m


def _pad_axis(a, axis, target):
    pad = target - a.shape[axis]
    if pad <= 0:
        return a
    widths = [(0, 0)] * a.ndim
    widths[axis] = (0, pad)
    return jnp.pad(a, widths)


def _make_kernel(vocab_p, dim_true, eps):
    def kernel(idx_ref, emb_ref, wt_ref, w_ref, b1_ref, b2_ref, g_ref, bt_ref,
               out_ref, loss_ref):
        tb = idx_ref.shape[0]

        # --- embedding gather on the MXU: one_hot(idx) @ table (bf16 x bf16 -> f32) ----
        idx = idx_ref[...]                                           # (TB, 1) int32
        lane_v = jax.lax.broadcasted_iota(jnp.int32, (tb, vocab_p), 1)
        onehot = (lane_v == idx).astype(emb_ref.dtype)               # (TB, Vp) bf16
        adj = jnp.dot(onehot, emb_ref[...],
                      preferred_element_type=jnp.float32)            # (TB, Dp) f32
        # (adj holds bf16 table values exactly, so the cast below is lossless.)

        # --- tied autoencoder (W^T passed pre-transposed; no per-step XLU transpose) ---
        h = jnp.dot(adj.astype(wt_ref.dtype), wt_ref[...],
                    preferred_element_type=jnp.float32)              # (TB, Kp)
        enc = jnp.tanh(h + b1_ref[...])                              # (TB, Kp) f32
        recon = jnp.dot(enc.astype(w_ref.dtype), w_ref[...],
                        preferred_element_type=jnp.float32) + b2_ref[...]  # (TB, Dp)

        # --- LayerNorm over the true (unpadded) feature width ---------------------------
        kp = enc.shape[-1]
        if kp == dim_true:
            mean = jnp.mean(enc, axis=-1, keepdims=True)
            var = jnp.mean((enc - mean) ** 2, axis=-1, keepdims=True)
        else:
            lane_d = jax.lax.broadcasted_iota(jnp.int32, enc.shape, 1)
            valid = (lane_d < dim_true).astype(jnp.float32)
            mean = jnp.sum(enc * valid, axis=-1, keepdims=True) / dim_true
            var = jnp.sum(((enc - mean) * valid) ** 2,
                          axis=-1, keepdims=True) / dim_true
        normed = (enc - mean) * jax.lax.rsqrt(var + eps)
        out_ref[...] = (normed * g_ref[...] + bt_ref[...]).astype(out_ref.dtype)

        # --- per-row sparse autoencoder error (reduced to the scalar mean in wrapper) ---
        nz = (adj != 0.0).astype(jnp.float32)    # padded cols of adj are 0 -> excluded
        diff = nz * (adj - recon)
        num = jnp.sum(diff * diff, axis=-1, keepdims=True)
        den = jnp.sum(nz, axis=-1, keepdims=True)
        # Guard: all-zero embedding row would NaN in the reference; clamp instead.
        loss_ref[...] = num / jnp.maximum(den, 1.0)

    return kernel


def _run_rows(idx, emb_p, wt_p, w_p, b1_p, b2_p, g_p, bt_p, *,
              dim, eps, block_rows, out_dtype):
    """Run the fused kernel over a flat int32 index vector. Returns (out (M, dim), loss (M,))."""
    M = idx.shape[0]
    Vp, Dp = emb_p.shape
    Kp = w_p.shape[0]

    TB = min(block_rows, _round_up(M, 8))
    Npad = _round_up(M, TB)
    idx_p = _pad_axis(idx, 0, Npad).reshape(Npad, 1)
    grid = (Npad // TB,)
    kernel = _make_kernel(Vp, dim, float(eps))

    # Generation-aware VMEM ceiling (~48 MiB on v7x's 64 MiB/TC, ~96 MiB on v5e/v6e).
    try:
        vmem_cap = int(pltpu.get_tpu_info().vmem_capacity_bytes)
    except Exception:
        vmem_cap = 64 * 1024 * 1024
    vmem_ceiling = (vmem_cap * 3) // 4

    param_itemsize = int(jnp.dtype(emb_p.dtype).itemsize)
    resident_bytes = (int(emb_p.size) + int(wt_p.size) + int(w_p.size)) * param_itemsize \
        + 4 * int(b1_p.size + b2_p.size + g_p.size + bt_p.size)
    streamed_bytes = TB * (Kp * int(jnp.dtype(out_dtype).itemsize) + 8)  # out + idx + loss

    def build(single_buffer_residents):
        def resident(shape):
            if single_buffer_residents:
                return pl.BlockSpec(shape, lambda i: (0, 0),
                                    pipeline_mode=pl.Buffered(1))
            return pl.BlockSpec(shape, lambda i: (0, 0))

        mult = 1 if single_buffer_residents else 2
        need = mult * resident_bytes + 2 * 2 * streamed_bytes + (4 << 20)  # + temp slack
        vmem_limit = int(min(max(need, 16 << 20), vmem_ceiling))

        return pl.pallas_call(
            kernel,
            out_shape=(
                jax.ShapeDtypeStruct((Npad, Kp), out_dtype),
                jax.ShapeDtypeStruct((Npad, 1), jnp.float32),
            ),
            grid_spec=pltpu.PrefetchScalarGridSpec(
                num_scalar_prefetch=0,
                grid=grid,
                in_specs=[
                    pl.BlockSpec((TB, 1), lambda i: (i, 0)),   # index block (streamed)
                    resident((Vp, Dp)),                        # embedding table (bf16)
                    resident((Dp, Kp)),                        # W^T (bf16)
                    resident((Kp, Dp)),                        # W   (bf16)
                    resident((1, Kp)),                         # bias1
                    resident((1, Dp)),                         # bias2
                    resident((1, Kp)),                         # LayerNorm gamma
                    resident((1, Kp)),                         # LayerNorm beta
                ],
                out_specs=(
                    pl.BlockSpec((TB, Kp), lambda i: (i, 0)),  # normalized encoding
                    pl.BlockSpec((TB, 1), lambda i: (i, 0)),   # per-row recon error
                ),
            ),
            compiler_params=pltpu.CompilerParams(
                dimension_semantics=("parallel",),
                vmem_limit_bytes=vmem_limit,
            ),
        )

    args = (idx_p, emb_p, wt_p, w_p, b1_p, b2_p, g_p, bt_p)
    try:
        out_p, loss_rows = build(True)(*args)
    except Exception:
        # pl.Buffered(1) single-buffering not supported on this jax/Mosaic version:
        # fall back to default double-buffered resident blocks (correctness identical).
        out_p, loss_rows = build(False)(*args)

    return out_p[:M, :dim], loss_rows[:M, 0]


def multiple_embedding_forward(x, embedding_weight, w, b1, b2, ln_gamma, ln_beta, *,
                               eps=1e-5, block_rows=512, out_dtype=jnp.float32,
                               param_dtype=jnp.bfloat16, unique_vocab_shortcut=True):
    """Fused Pallas forward of MultipleEmbedding (eval mode).

    x                : integer index array (any shape)            -> flattened to N rows
    embedding_weight : (V, D_in) float table
    w                : (dim, D_in) tied autoencoder weight
    b1               : (dim,)  encoder bias
    b2               : (D_in,) decoder bias
    ln_gamma/ln_beta : (dim,)  LayerNorm affine params
    returns (output (N, dim), recon_loss (1,))
    """
    V, D_in = embedding_weight.shape
    dim = w.shape[0]
    assert w.shape == (dim, D_in)

    # PyTorch would raise on out-of-range indices; clamp instead (no data-dep raise in JAX).
    idx = jnp.clip(x.reshape(-1).astype(jnp.int32), 0, V - 1)
    N = idx.shape[0]

    # Lane-dense padding: vocab and both feature axes to multiples of 128.
    Vp = _round_up(V, 128)
    Dp = _round_up(D_in, 128)
    Kp = _round_up(dim, 128)

    emb_p = _pad_axis(_pad_axis(embedding_weight.astype(param_dtype), 1, Dp), 0, Vp)  # (Vp, Dp)
    w_p = _pad_axis(_pad_axis(w.astype(param_dtype), 1, Dp), 0, Kp)                   # (Kp, Dp)
    wt_p = jnp.transpose(w_p)                                                         # (Dp, Kp)
    b1_p = _pad_axis(b1.astype(jnp.float32).reshape(1, dim), 1, Kp)                   # (1, Kp)
    b2_p = _pad_axis(b2.astype(jnp.float32).reshape(1, D_in), 1, Dp)                  # (1, Dp)
    g_p = _pad_axis(ln_gamma.astype(jnp.float32).reshape(1, dim), 1, Kp)              # (1, Kp)
    bt_p = _pad_axis(ln_beta.astype(jnp.float32).reshape(1, dim), 1, Kp)              # (1, Kp)

    run = lambda flat_idx: _run_rows(flat_idx, emb_p, wt_p, w_p, b1_p, b2_p, g_p, bt_p,
                                     dim=dim, eps=eps, block_rows=block_rows,
                                     out_dtype=out_dtype)

    if unique_vocab_shortcut and N > V:
        # Eval-mode shortcut: dropout is identity, so every (out_row, loss_row) is a pure
        # function of the vocab id. Run the heavy kernel once per vocab row, then gather.
        out_v, loss_v = run(jnp.arange(V, dtype=jnp.int32))          # (V, dim), (V,)
        out = jnp.take(out_v, idx, axis=0)
        recon_loss = jnp.mean(jnp.take(loss_v, idx, axis=0)).reshape(1)
        return out, recon_loss.astype(jnp.float32)

    out, loss_rows = run(idx)
    recon_loss = (jnp.sum(loss_rows) / N).reshape(1).astype(jnp.float32)
    return out, recon_loss


def _reference(x_np, e64, w64, b1_64, b2_64, g64, bt64, eps=1e-5):
    """float64 host reference (matches the torch module in eval mode)."""
    idx = x_np.reshape(-1)
    adj = e64[idx]
    enc = np.tanh(adj @ w64.T + b1_64)
    recon = enc @ w64 + b2_64
    mu = enc.mean(-1, keepdims=True)
    var = ((enc - mu) ** 2).mean(-1, keepdims=True)
    out = (enc - mu) / np.sqrt(var + eps) * g64 + bt64
    mask = (adj != 0).astype(np.float64)
    loss = np.mean(np.sum((mask * (adj - recon)) ** 2, -1) / np.sum(mask, -1))
    return out, loss


if __name__ == "__main__":
    key = jax.random.PRNGKey(0)
    k_emb, k_x, k_x2, k_w, k_b1, k_b2 = jax.random.split(key, 6)

    V, D_in = 64, 128      # vocab size, embedding width (input_size)
    dim = 96               # projection / LayerNorm width (exercises lane-padding path)
    B, S = 2, 8            # index tensor shape -> N = 16 gathered rows (< V path)
    B2, S2 = 16, 8         # second case -> N = 128 (> V: exercises eval-mode shortcut)

    embedding_weight = jax.random.normal(k_emb, (V, D_in), dtype=jnp.float32)
    x = jax.random.randint(k_x, (B, S), 0, V, dtype=jnp.int32)
    x2 = jax.random.randint(k_x2, (B2, S2), 0, V, dtype=jnp.int32)

    w = jax.random.uniform(k_w, (dim, D_in), jnp.float32, -0.1, 0.1)
    b1 = jax.random.uniform(k_b1, (dim,), jnp.float32, -0.1, 0.1)
    b2 = jax.random.uniform(k_b2, (D_in,), jnp.float32, -0.1, 0.1)
    gamma = jnp.ones((dim,), jnp.float32)   # nn.LayerNorm default init
    beta = jnp.zeros((dim,), jnp.float32)

    out, recon_loss = multiple_embedding_forward(
        x, embedding_weight, w, b1, b2, gamma, beta)
    out = jax.block_until_ready(out)
    recon_loss = jax.block_until_ready(recon_loss)

    out2, recon_loss2 = multiple_embedding_forward(
        x2, embedding_weight, w, b1, b2, gamma, beta)
    out2 = jax.block_until_ready(out2)
    recon_loss2 = jax.block_until_ready(recon_loss2)

    # Reference uses the bf16-quantized table / tied weight (the values the kernel stores),
    # so it isolates kernel arithmetic from the deliberate bf16 storage trade-off.
    e_q = np.asarray(embedding_weight.astype(jnp.bfloat16).astype(jnp.float32), np.float64)
    w_q = np.asarray(w.astype(jnp.bfloat16).astype(jnp.float32), np.float64)
    b1_64 = np.asarray(b1, np.float64)
    b2_64 = np.asarray(b2, np.float64)
    g64 = np.asarray(gamma, np.float64)
    bt64 = np.asarray(beta, np.float64)

    out_ref, loss_ref = _reference(np.asarray(x), e_q, w_q, b1_64, b2_64, g64, bt64)
    out_ref2, loss_ref2 = _reference(np.asarray(x2), e_q, w_q, b1_64, b2_64, g64, bt64)

    assert out.shape == (B * S, dim) and recon_loss.shape == (1,)
    assert out2.shape == (B2 * S2, dim) and recon_loss2.shape == (1,)
    assert np.allclose(np.asarray(out, np.float64), out_ref, rtol=1e-2, atol=1e-2), \
        "Pallas output mismatch vs reference (standard path)"
    assert abs(float(recon_loss[0]) - loss_ref) <= 1e-2 * max(1.0, abs(loss_ref)), \
        "Pallas recon_loss mismatch vs reference (standard path)"
    assert np.allclose(np.asarray(out2, np.float64), out_ref2, rtol=1e-2, atol=1e-2), \
        "Pallas output mismatch vs reference (vocab-shortcut path)"
    assert abs(float(recon_loss2[0]) - loss_ref2) <= 1e-2 * max(1.0, abs(loss_ref2)), \
        "Pallas recon_loss mismatch vs reference (vocab-shortcut path)"

    print("KERNEL_OK")
</pallas_src>

<mosaic_0001>
module attributes {stable_mosaic.version = 11 : i64} {
  func.func @kernel(%arg0: i32, %arg1: memref<16x1xi32, #tpu.memory_space<vmem>>, %arg2: memref<128x128xbf16, #tpu.memory_space<vmem>>, %arg3: memref<128x128xbf16, #tpu.memory_space<vmem>>, %arg4: memref<128x128xbf16, #tpu.memory_space<vmem>>, %arg5: memref<1x128xf32, #tpu.memory_space<vmem>>, %arg6: memref<1x128xf32, #tpu.memory_space<vmem>>, %arg7: memref<1x128xf32, #tpu.memory_space<vmem>>, %arg8: memref<1x128xf32, #tpu.memory_space<vmem>>, %arg9: memref<16x128xf32, #tpu.memory_space<vmem>>, %arg10: memref<16x1xf32, #tpu.memory_space<vmem>>) attributes {dimension_semantics = [#tpu.dimension_semantics<parallel>], iteration_bounds = array<i64: 1>, scalar_prefetch = 0 : i64, scratch_operands = 0 : i64, tpu.core_type = #tpu.core_type<tc>, window_params = [{transform_indices = @transform_0, window_bounds = array<i64: 16, 1>}, {pipeline_mode = #tpu.pipeline_mode<synchronous>, transform_indices = @transform_1, window_bounds = array<i64: 128, 128>}, {pipeline_mode = #tpu.pipeline_mode<synchronous>, transform_indices = @transform_2, window_bounds = array<i64: 128, 128>}, {pipeline_mode = #tpu.pipeline_mode<synchronous>, transform_indices = @transform_3, window_bounds = array<i64: 128, 128>}, {pipeline_mode = #tpu.pipeline_mode<synchronous>, transform_indices = @transform_4, window_bounds = array<i64: 1, 128>}, {pipeline_mode = #tpu.pipeline_mode<synchronous>, transform_indices = @transform_5, window_bounds = array<i64: 1, 128>}, {pipeline_mode = #tpu.pipeline_mode<synchronous>, transform_indices = @transform_6, window_bounds = array<i64: 1, 128>}, {pipeline_mode = #tpu.pipeline_mode<synchronous>, transform_indices = @transform_7, window_bounds = array<i64: 1, 128>}, {transform_indices = @transform_8, window_bounds = array<i64: 16, 128>}, {transform_indices = @transform_9, window_bounds = array<i64: 16, 1>}]} {
    %c0 = arith.constant 0 : index
    %c0_0 = arith.constant 0 : index
    %0 = vector.load %arg1[%c0, %c0_0] : memref<16x1xi32, #tpu.memory_space<vmem>>, vector<16x1xi32>
    %1 = tpu.iota {dimensions = array<i32: 1>} : vector<16x128xi32>
    %2 = vector.broadcast %0 : vector<16x1xi32> to vector<16x128xi32>
    %3 = arith.cmpi eq, %1, %2 : vector<16x128xi32>
    %4 = arith.extui %3 : vector<16x128xi1> to vector<16x128xi32>
    %5 = arith.sitofp %4 : vector<16x128xi32> to vector<16x128xf32>
    %6 = arith.truncf %5 : vector<16x128xf32> to vector<16x128xbf16>
    %c0_1 = arith.constant 0 : index
    %c0_2 = arith.constant 0 : index
    %7 = vector.load %arg2[%c0_1, %c0_2] : memref<128x128xbf16, #tpu.memory_space<vmem>>, vector<128x128xbf16>
    %cst = arith.constant dense<0.000000e+00> : vector<16x128xf32>
    %8 = tpu.matmul %6, %7, %cst {dimension_numbers = #tpu.dot_dimension_numbers<[1], [0], [0], [1], [0, 0, 1, 1], [], []>} : vector<16x128xbf16>, vector<128x128xbf16>, vector<16x128xf32> -> vector<16x128xf32>
    %9 = arith.truncf %8 : vector<16x128xf32> to vector<16x128xbf16>
    %c0_3 = arith.constant 0 : index
    %c0_4 = arith.constant 0 : index
    %10 = vector.load %arg3[%c0_3, %c0_4] : memref<128x128xbf16, #tpu.memory_space<vmem>>, vector<128x128xbf16>
    %cst_5 = arith.constant dense<0.000000e+00> : vector<16x128xf32>
    %11 = tpu.matmul %9, %10, %cst_5 {dimension_numbers = #tpu.dot_dimension_numbers<[1], [0], [0], [1], [0, 0, 1, 1], [], []>} : vector<16x128xbf16>, vector<128x128xbf16>, vector<16x128xf32> -> vector<16x128xf32>
    %c0_6 = arith.constant 0 : index
    %c0_7 = arith.constant 0 : index
    %12 = vector.load %arg5[%c0_6, %c0_7] : memref<1x128xf32, #tpu.memory_space<vmem>>, vector<1x128xf32>
    %13 = vector.broadcast %12 : vector<1x128xf32> to vector<16x128xf32>
    %14 = arith.addf %11, %13 : vector<16x128xf32>
    %15 = math.tanh %14 : vector<16x128xf32>
    %16 = arith.truncf %15 : vector<16x128xf32> to vector<16x128xbf16>
    %c0_8 = arith.constant 0 : index
    %c0_9 = arith.constant 0 : index
    %17 = vector.load %arg4[%c0_8, %c0_9] : memref<128x128xbf16, #tpu.memory_space<vmem>>, vector<128x128xbf16>
    %cst_10 = arith.constant dense<0.000000e+00> : vector<16x128xf32>
    %18 = tpu.matmul %16, %17, %cst_10 {dimension_numbers = #tpu.dot_dimension_numbers<[1], [0], [0], [1], [0, 0, 1, 1], [], []>} : vector<16x128xbf16>, vector<128x128xbf16>, vector<16x128xf32> -> vector<16x128xf32>
    %c0_11 = arith.constant 0 : index
    %c0_12 = arith.constant 0 : index
    %19 = vector.load %arg6[%c0_11, %c0_12] : memref<1x128xf32, #tpu.memory_space<vmem>>, vector<1x128xf32>
    %20 = vector.broadcast %19 : vector<1x128xf32> to vector<16x128xf32>
    %21 = arith.addf %18, %20 : vector<16x128xf32>
    %22 = tpu.iota {dimensions = array<i32: 1>} : vector<16x128xi32>
    %c96_i32 = arith.constant 96 : i32
    %23 = vector.broadcast %c96_i32 : i32 to vector<16x128xi32>
    %24 = arith.cmpi slt, %22, %23 : vector<16x128xi32>
    %25 = arith.extui %24 : vector<16x128xi1> to vector<16x128xi32>
    %26 = arith.sitofp %25 : vector<16x128xi32> to vector<16x128xf32>
    %27 = arith.mulf %15, %26 : vector<16x128xf32>
    %cst_13 = arith.constant dense<0.000000e+00> : vector<16xf32>
    %28 = vector.multi_reduction <add>, %27, %cst_13 [1] : vector<16x128xf32> to vector<16xf32>
    %29 = vector.shape_cast %28 : vector<16xf32> to vector<16x1xf32>
    %cst_14 = arith.constant 9.600000e+01 : f32
    %30 = vector.broadcast %cst_14 : f32 to vector<16x1xf32>
    %31 = arith.divf %29, %30 : vector<16x1xf32>
    %32 = vector.broadcast %31 : vector<16x1xf32> to vector<16x128xf32>
    %33 = arith.subf %15, %32 : vector<16x128xf32>
    %34 = arith.mulf %33, %26 : vector<16x128xf32>
    %35 = arith.mulf %34, %34 : vector<16x128xf32>
    %cst_15 = arith.constant dense<0.000000e+00> : vector<16xf32>
    %36 = vector.multi_reduction <add>, %35, %cst_15 [1] : vector<16x128xf32> to vector<16xf32>
    %37 = vector.shape_cast %36 : vector<16xf32> to vector<16x1xf32>
    %cst_16 = arith.constant 9.600000e+01 : f32
    %38 = vector.broadcast %cst_16 : f32 to vector<16x1xf32>
    %39 = arith.divf %37, %38 : vector<16x1xf32>
    %40 = vector.broadcast %31 : vector<16x1xf32> to vector<16x128xf32>
    %41 = arith.subf %15, %40 : vector<16x128xf32>
    %cst_17 = arith.constant 9.99999974E-6 : f32
    %42 = vector.broadcast %cst_17 : f32 to vector<16x1xf32>
    %43 = arith.addf %39, %42 : vector<16x1xf32>
    %44 = math.rsqrt %43 : vector<16x1xf32>
    %45 = vector.broadcast %44 : vector<16x1xf32> to vector<16x128xf32>
    %46 = arith.mulf %41, %45 : vector<16x128xf32>
    %c0_18 = arith.constant 0 : index
    %c0_19 = arith.constant 0 : index
    %47 = vector.load %arg7[%c0_18, %c0_19] : memref<1x128xf32, #tpu.memory_space<vmem>>, vector<1x128xf32>
    %48 = vector.broadcast %47 : vector<1x128xf32> to vector<16x128xf32>
    %49 = arith.mulf %46, %48 : vector<16x128xf32>
    %c0_20 = arith.constant 0 : index
    %c0_21 = arith.constant 0 : index
    %50 = vector.load %arg8[%c0_20, %c0_21] : memref<1x128xf32, #tpu.memory_space<vmem>>, vector<1x128xf32>
    %51 = vector.broadcast %50 : vector<1x128xf32> to vector<16x128xf32>
    %52 = arith.addf %49, %51 : vector<16x128xf32>
    %c0_22 = arith.constant 0 : index
    %c0_23 = arith.constant 0 : index
    %53 = vector.load %arg9[%c0_22, %c0_23] : memref<16x128xf32, #tpu.memory_space<vmem>>, vector<16x128xf32>
    tpu.vector_store %arg9[%c0_22, %c0_23], %52 {strides = array<i32>} : memref<16x128xf32, #tpu.memory_space<vmem>>, vector<16x128xf32>,
    %cst_24 = arith.constant 0.000000e+00 : f32
    %54 = vector.broadcast %cst_24 : f32 to vector<16x128xf32>
    %55 = arith.cmpf one, %8, %54 : vector<16x128xf32>
    %56 = arith.extui %55 : vector<16x128xi1> to vector<16x128xi32>
    %57 = arith.sitofp %56 : vector<16x128xi32> to vector<16x128xf32>
    %58 = arith.subf %8, %21 : vector<16x128xf32>
    %59 = arith.mulf %57, %58 : vector<16x128xf32>
    %60 = arith.mulf %59, %59 : vector<16x128xf32>
    %cst_25 = arith.constant dense<0.000000e+00> : vector<16xf32>
    %61 = vector.multi_reduction <add>, %60, %cst_25 [1] : vector<16x128xf32> to vector<16xf32>
    %62 = vector.shape_cast %61 : vector<16xf32> to vector<16x1xf32>
    %cst_26 = arith.constant dense<0.000000e+00> : vector<16xf32>
    %63 = vector.multi_reduction <add>, %57, %cst_26 [1] : vector<16x128xf32> to vector<16xf32>
    %64 = vector.shape_cast %63 : vector<16xf32> to vector<16x1xf32>
    %cst_27 = arith.constant 1.000000e+00 : f32
    %65 = vector.broadcast %cst_27 : f32 to vector<16x1xf32>
    %66 = arith.maximumf %64, %65 : vector<16x1xf32>
    %67 = arith.divf %62, %66 : vector<16x1xf32>
    %c0_28 = arith.constant 0 : index
    %c0_29 = arith.constant 0 : index
    %68 = vector.load %arg10[%c0_28, %c0_29] : memref<16x1xf32, #tpu.memory_space<vmem>>, vector<16x1xf32>
    tpu.vector_store %arg10[%c0_28, %c0_29], %67 {strides = array<i32>} : memref<16x1xf32, #tpu.memory_space<vmem>>, vector<16x1xf32>,
    return
  }
  func.func @transform_0(%arg0: i32) -> (i32, i32) {
    %c0_i32 = arith.constant 0 : i32
    %c0_i32_0 = arith.constant 0 : i32
    return %arg0, %c0_i32 : i32, i32
  }
  func.func @transform_1(%arg0: i32) -> (i32, i32) {
    %c0_i32 = arith.constant 0 : i32
    %c0_i32_0 = arith.constant 0 : i32
    %c0_i32_1 = arith.constant 0 : i32
    return %c0_i32, %c0_i32_0 : i32, i32
  }
  func.func @transform_2(%arg0: i32) -> (i32, i32) {
    %c0_i32 = arith.constant 0 : i32
    %c0_i32_0 = arith.constant 0 : i32
    %c0_i32_1 = arith.constant 0 : i32
    return %c0_i32, %c0_i32_0 : i32, i32
  }
  func.func @transform_3(%arg0: i32) -> (i32, i32) {
    %c0_i32 = arith.constant 0 : i32
    %c0_i32_0 = arith.constant 0 : i32
    %c0_i32_1 = arith.constant 0 : i32
    return %c0_i32, %c0_i32_0 : i32, i32
  }
  func.func @transform_4(%arg0: i32) -> (i32, i32) {
    %c0_i32 = arith.constant 0 : i32
    %c0_i32_0 = arith.constant 0 : i32
    %c0_i32_1 = arith.constant 0 : i32
    return %c0_i32, %c0_i32_0 : i32, i32
  }
  func.func @transform_5(%arg0: i32) -> (i32, i32) {
    %c0_i32 = arith.constant 0 : i32
    %c0_i32_0 = arith.constant 0 : i32
    %c0_i32_1 = arith.constant 0 : i32
    return %c0_i32, %c0_i32_0 : i32, i32
  }
  func.func @transform_6(%arg0: i32) -> (i32, i32) {
    %c0_i32 = arith.constant 0 : i32
    %c0_i32_0 = arith.constant 0 : i32
    %c0_i32_1 = arith.constant 0 : i32
    return %c0_i32, %c0_i32_0 : i32, i32
  }
  func.func @transform_7(%arg0: i32) -> (i32, i32) {
    %c0_i32 = arith.constant 0 : i32
    %c0_i32_0 = arith.constant 0 : i32
    %c0_i32_1 = arith.constant 0 : i32
    return %c0_i32, %c0_i32_0 : i32, i32
  }
  func.func @transform_8(%arg0: i32) -> (i32, i32) {
    %c0_i32 = arith.constant 0 : i32
    %c0_i32_0 = arith.constant 0 : i32
    return %arg0, %c0_i32 : i32, i32
  }
  func.func @transform_9(%arg0: i32) -> (i32, i32) {
    %c0_i32 = arith.constant 0 : i32
    %c0_i32_0 = arith.constant 0 : i32
    return %arg0, %c0_i32 : i32, i32
  }
}

module attributes {stable_mosaic.version = 11 : i64} {
  func.func @kernel(%arg0: i32, %arg1: memref<16x1xi32, #tpu.memory_space<vmem>>, %arg2: memref<128x128xbf16, #tpu.memory_space<vmem>>, %arg3: memref<128x128xbf16, #tpu.memory_space<vmem>>, %arg4: memref<128x128xbf16, #tpu.memory_space<vmem>>, %arg5: memref<1x128xf32, #tpu.memory_space<vmem>>, %arg6: memref<1x128xf32, #tpu.memory_space<vmem>>, %arg7: memref<1x128xf32, #tpu.memory_space<vmem>>, %arg8: memref<1x128xf32, #tpu.memory_space<vmem>>, %arg9: memref<16x128xf32, #tpu.memory_space<vmem>>, %arg10: memref<16x1xf32, #tpu.memory_space<vmem>>) attributes {dimension_semantics = [#tpu.dimension_semantics<parallel>], iteration_bounds = array<i64: 1>, scalar_prefetch = 0 : i64, scratch_operands = 0 : i64, tpu.core_type = #tpu.core_type<tc>, window_params = [{transform_indices = @transform_0, window_bounds = array<i64: 16, 1>}, {pipeline_mode = #tpu.pipeline_mode<synchronous>, transform_indices = @transform_1, window_bounds = array<i64: 128, 128>}, {pipeline_mode = #tpu.pipeline_mode<synchronous>, transform_indices = @transform_2, window_bounds = array<i64: 128, 128>}, {pipeline_mode = #tpu.pipeline_mode<synchronous>, transform_indices = @transform_3, window_bounds = array<i64: 128, 128>}, {pipeline_mode = #tpu.pipeline_mode<synchronous>, transform_indices = @transform_4, window_bounds = array<i64: 1, 128>}, {pipeline_mode = #tpu.pipeline_mode<synchronous>, transform_indices = @transform_5, window_bounds = array<i64: 1, 128>}, {pipeline_mode = #tpu.pipeline_mode<synchronous>, transform_indices = @transform_6, window_bounds = array<i64: 1, 128>}, {pipeline_mode = #tpu.pipeline_mode<synchronous>, transform_indices = @transform_7, window_bounds = array<i64: 1, 128>}, {transform_indices = @transform_8, window_bounds = array<i64: 16, 128>}, {transform_indices = @transform_9, window_bounds = array<i64: 16, 1>}]} {
    %c0 = arith.constant 0 : index
    %c0_0 = arith.constant 0 : index
    %0 = vector.load %arg1[%c0, %c0_0] : memref<16x1xi32, #tpu.memory_space<vmem>>, vector<16x1xi32>
    %1 = tpu.iota {dimensions = array<i32: 1>} : vector<16x128xi32>
    %2 = vector.broadcast %0 : vector<16x1xi32> to vector<16x128xi32>
    %3 = arith.cmpi eq, %1, %2 : vector<16x128xi32>
    %4 = arith.extui %3 : vector<16x128xi1> to vector<16x128xi32>
    %5 = arith.sitofp %4 : vector<16x128xi32> to vector<16x128xf32>
    %6 = arith.truncf %5 : vector<16x128xf32> to vector<16x128xbf16>
    %c0_1 = arith.constant 0 : index
    %c0_2 = arith.constant 0 : index
    %7 = vector.load %arg2[%c0_1, %c0_2] : memref<128x128xbf16, #tpu.memory_space<vmem>>, vector<128x128xbf16>
    %cst = arith.constant dense<0.000000e+00> : vector<16x128xf32>
    %8 = tpu.matmul %6, %7, %cst {dimension_numbers = #tpu.dot_dimension_numbers<[1], [0], [0], [1], [0, 0, 1, 1], [], []>} : vector<16x128xbf16>, vector<128x128xbf16>, vector<16x128xf32> -> vector<16x128xf32>
    %9 = arith.truncf %8 : vector<16x128xf32> to vector<16x128xbf16>
    %c0_3 = arith.constant 0 : index
    %c0_4 = arith.constant 0 : index
    %10 = vector.load %arg3[%c0_3, %c0_4] : memref<128x128xbf16, #tpu.memory_space<vmem>>, vector<128x128xbf16>
    %cst_5 = arith.constant dense<0.000000e+00> : vector<16x128xf32>
    %11 = tpu.matmul %9, %10, %cst_5 {dimension_numbers = #tpu.dot_dimension_numbers<[1], [0], [0], [1], [0, 0, 1, 1], [], []>} : vector<16x128xbf16>, vector<128x128xbf16>, vector<16x128xf32> -> vector<16x128xf32>
    %c0_6 = arith.constant 0 : index
    %c0_7 = arith.constant 0 : index
    %12 = vector.load %arg5[%c0_6, %c0_7] : memref<1x128xf32, #tpu.memory_space<vmem>>, vector<1x128xf32>
    %13 = vector.broadcast %12 : vector<1x128xf32> to vector<16x128xf32>
    %14 = arith.addf %11, %13 : vector<16x128xf32>
    %15 = math.tanh %14 : vector<16x128xf32>
    %16 = arith.truncf %15 : vector<16x128xf32> to vector<16x128xbf16>
    %c0_8 = arith.constant 0 : index
    %c0_9 = arith.constant 0 : index
    %17 = vector.load %arg4[%c0_8, %c0_9] : memref<128x128xbf16, #tpu.memory_space<vmem>>, vector<128x128xbf16>
    %cst_10 = arith.constant dense<0.000000e+00> : vector<16x128xf32>
    %18 = tpu.matmul %16, %17, %cst_10 {dimension_numbers = #tpu.dot_dimension_numbers<[1], [0], [0], [1], [0, 0, 1, 1], [], []>} : vector<16x128xbf16>, vector<128x128xbf16>, vector<16x128xf32> -> vector<16x128xf32>
    %c0_11 = arith.constant 0 : index
    %c0_12 = arith.constant 0 : index
    %19 = vector.load %arg6[%c0_11, %c0_12] : memref<1x128xf32, #tpu.memory_space<vmem>>, vector<1x128xf32>
    %20 = vector.broadcast %19 : vector<1x128xf32> to vector<16x128xf32>
    %21 = arith.addf %18, %20 : vector<16x128xf32>
    %22 = tpu.iota {dimensions = array<i32: 1>} : vector<16x128xi32>
    %c96_i32 = arith.constant 96 : i32
    %23 = vector.broadcast %c96_i32 : i32 to vector<16x128xi32>
    %24 = arith.cmpi slt, %22, %23 : vector<16x128xi32>
    %25 = arith.extui %24 : vector<16x128xi1> to vector<16x128xi32>
    %26 = arith.sitofp %25 : vector<16x128xi32> to vector<16x128xf32>
    %27 = arith.mulf %15, %26 : vector<16x128xf32>
    %cst_13 = arith.constant dense<0.000000e+00> : vector<16xf32>
    %28 = vector.multi_reduction <add>, %27, %cst_13 [1] : vector<16x128xf32> to vector<16xf32>
    %29 = vector.shape_cast %28 : vector<16xf32> to vector<16x1xf32>
    %cst_14 = arith.constant 9.600000e+01 : f32
    %30 = vector.broadcast %cst_14 : f32 to vector<16x1xf32>
    %31 = arith.divf %29, %30 : vector<16x1xf32>
    %32 = vector.broadcast %31 : vector<16x1xf32> to vector<16x128xf32>
    %33 = arith.subf %15, %32 : vector<16x128xf32>
    %34 = arith.mulf %33, %26 : vector<16x128xf32>
    %35 = arith.mulf %34, %34 : vector<16x128xf32>
    %cst_15 = arith.constant dense<0.000000e+00> : vector<16xf32>
    %36 = vector.multi_reduction <add>, %35, %cst_15 [1] : vector<16x128xf32> to vector<16xf32>
    %37 = vector.shape_cast %36 : vector<16xf32> to vector<16x1xf32>
    %cst_16 = arith.constant 9.600000e+01 : f32
    %38 = vector.broadcast %cst_16 : f32 to vector<16x1xf32>
    %39 = arith.divf %37, %38 : vector<16x1xf32>
    %40 = vector.broadcast %31 : vector<16x1xf32> to vector<16x128xf32>
    %41 = arith.subf %15, %40 : vector<16x128xf32>
    %cst_17 = arith.constant 9.99999974E-6 : f32
    %42 = vector.broadcast %cst_17 : f32 to vector<16x1xf32>
    %43 = arith.addf %39, %42 : vector<16x1xf32>
    %44 = math.rsqrt %43 : vector<16x1xf32>
    %45 = vector.broadcast %44 : vector<16x1xf32> to vector<16x128xf32>
    %46 = arith.mulf %41, %45 : vector<16x128xf32>
    %c0_18 = arith.constant 0 : index
    %c0_19 = arith.constant 0 : index
    %47 = vector.load %arg7[%c0_18, %c0_19] : memref<1x128xf32, #tpu.memory_space<vmem>>, vector<1x128xf32>
    %48 = vector.broadcast %47 : vector<1x128xf32> to vector<16x128xf32>
    %49 = arith.mulf %46, %48 : vector<16x128xf32>
    %c0_20 = arith.constant 0 : index
    %c0_21 = arith.constant 0 : index
    %50 = vector.load %arg8[%c0_20, %c0_21] : memref<1x128xf32, #tpu.memory_space<vmem>>, vector<1x128xf32>
    %51 = vector.broadcast %50 : vector<1x128xf32> to vector<16x128xf32>
    %52 = arith.addf %49, %51 : vector<16x128xf32>
    %c0_22 = arith.constant 0 : index
    %c0_23 = arith.constant 0 : index
    %53 = vector.load %arg9[%c0_22, %c0_23] : memref<16x128xf32, #tpu.memory_space<vmem>>, vector<16x128xf32>
    tpu.vector_store %arg9[%c0_22, %c0_23], %52 {strides = array<i32>} : memref<16x128xf32, #tpu.memory_space<vmem>>, vector<16x128xf32>,
    %cst_24 = arith.constant 0.000000e+00 : f32
    %54 = vector.broadcast %cst_24 : f32 to vector<16x128xf32>
    %55 = arith.cmpf one, %8, %54 : vector<16x128xf32>
    %56 = arith.extui %55 : vector<16x128xi1> to vector<16x128xi32>
    %57 = arith.sitofp %56 : vector<16x128xi32> to vector<16x128xf32>
    %58 = arith.subf %8, %21 : vector<16x128xf32>
    %59 = arith.mulf %57, %58 : vector<16x128xf32>
    %60 = arith.mulf %59, %59 : vector<16x128xf32>
    %cst_25 = arith.constant dense<0.000000e+00> : vector<16xf32>
    %61 = vector.multi_reduction <add>, %60, %cst_25 [1] : vector<16x128xf32> to vector<16xf32>
    %62 = vector.shape_cast %61 : vector<16xf32> to vector<16x1xf32>
    %cst_26 = arith.constant dense<0.000000e+00> : vector<16xf32>
    %63 = vector.multi_reduction <add>, %57, %cst_26 [1] : vector<16x128xf32> to vector<16xf32>
    %64 = vector.shape_cast %63 : vector<16xf32> to vector<16x1xf32>
    %cst_27 = arith.constant 1.000000e+00 : f32
    %65 = vector.broadcast %cst_27 : f32 to vector<16x1xf32>
    %66 = arith.maximumf %64, %65 : vector<16x1xf32>
    %67 = arith.divf %62, %66 : vector<16x1xf32>
    %c0_28 = arith.constant 0 : index
    %c0_29 = arith.constant 0 : index
    %68 = vector.load %arg10[%c0_28, %c0_29] : memref<16x1xf32, #tpu.memory_space<vmem>>, vector<16x1xf32>
    tpu.vector_store %arg10[%c0_28, %c0_29], %67 {strides = array<i32>} : memref<16x1xf32, #tpu.memory_space<vmem>>, vector<16x1xf32>,
    return
  }
  func.func @transform_0(%arg0: i32) -> (i32, i32) {
    %c0_i32 = arith.constant 0 : i32
    %c0_i32_0 = arith.constant 0 : i32
    return %arg0, %c0_i32 : i32, i32
  }
  func.func @transform_1(%arg0: i32) -> (i32, i32) {
    %c0_i32 = arith.constant 0 : i32
    %c0_i32_0 = arith.constant 0 : i32
    %c0_i32_1 = arith.constant 0 : i32
    return %c0_i32, %c0_i32_0 : i32, i32
  }
  func.func @transform_2(%arg0: i32) -> (i32, i32) {
    %c0_i32 = arith.constant 0 : i32
    %c0_i32_0 = arith.constant 0 : i32
    %c0_i32_1 = arith.constant 0 : i32
    return %c0_i32, %c0_i32_0 : i32, i32
  }
  func.func @transform_3(%arg0: i32) -> (i32, i32) {
    %c0_i32 = arith.constant 0 : i32
    %c0_i32_0 = arith.constant 0 : i32
    %c0_i32_1 = arith.constant 0 : i32
    return %c0_i32, %c0_i32_0 : i32, i32
  }
  func.func @transform_4(%arg0: i32) -> (i32, i32) {
    %c0_i32 = arith.constant 0 : i32
    %c0_i32_0 = arith.constant 0 : i32
    %c0_i32_1 = arith.constant 0 : i32
    return %c0_i32, %c0_i32_0 : i32, i32
  }
  func.func @transform_5(%arg0: i32) -> (i32, i32) {
    %c0_i32 = arith.constant 0 : i32
    %c0_i32_0 = arith.constant 0 : i32
    %c0_i32_1 = arith.constant 0 : i32
    return %c0_i32, %c0_i32_0 : i32, i32
  }
  func.func @transform_6(%arg0: i32) -> (i32, i32) {
    %c0_i32 = arith.constant 0 : i32
    %c0_i32_0 = arith.constant 0 : i32
    %c0_i32_1 = arith.constant 0 : i32
    return %c0_i32, %c0_i32_0 : i32, i32
  }
  func.func @transform_7(%arg0: i32) -> (i32, i32) {
    %c0_i32 = arith.constant 0 : i32
    %c0_i32_0 = arith.constant 0 : i32
    %c0_i32_1 = arith.constant 0 : i32
    return %c0_i32, %c0_i32_0 : i32, i32
  }
  func.func @transform_8(%arg0: i32) -> (i32, i32) {
    %c0_i32 = arith.constant 0 : i32
    %c0_i32_0 = arith.constant 0 : i32
    return %arg0, %c0_i32 : i32, i32
  }
  func.func @transform_9(%arg0: i32) -> (i32, i32) {
    %c0_i32 = arith.constant 0 : i32
    %c0_i32_0 = arith.constant 0 : i32
    return %arg0, %c0_i32 : i32, i32
  }
}

</mosaic_0001>

<bundles_post_ra>
// kernel: tpu_custom_call.1
= control target key start
LH: loop header
LB: loop body
LE: loop exit
PB: predicated region body
PF: predicated region fallthrough
CT: control target
= control target key end

     0   :  { %15 = vsyncpa [#allocation3], 0  ;;  %s923_s0 = inlined_call_operand.vmem [shape: s32[16,1], index: 0, kind: input, shape index: {}]   ;;  %s924_s1 = inlined_call_operand.hbm [shape: bf16[128,128], index: 1, kind: input, shape index: {}]   ;;  %s925_s2 = inlined_call_operand.hbm [shape: bf16[128,128], index: 2, kind: input, shape index: {}]   ;;  %s926_s3 = inlined_call_operand.hbm [shape: bf16[128,128], index: 3, kind: input, shape index: {}]   ;;  %s927_s4 = inlined_call_operand.vmem [shape: f32[1,128], index: 4, kind: input, shape index: {}]   ;;  %s928_s5 = inlined_call_operand.vmem [shape: f32[1,128], index: 5, kind: input, shape index: {}]   ;;  %s929_s6 = inlined_call_operand.vmem [shape: f32[1,128], index: 6, kind: input, shape index: {}]   ;;  %s930_s7 = inlined_call_operand.vmem [shape: f32[1,128], index: 7, kind: input, shape index: {}]   ;;  %s931_s8 = inlined_call_operand.hbm [shape: f32[16,128], index: 8, kind: output, shape index: {0}]   ;;  %s932_s9 = inlined_call_operand.vmem [shape: f32[16,1], index: 9, kind: output, shape index: {1}]  }
   0x1   :  { %16 = vsyncpa [#allocation6], 0 }
   0x2   :  { %17 = vsyncpa [#allocation4], 0  ;;  %s782_s30 = smov [#allocation5]   ;;  %s783_s11 = smov [#allocation2]  }
   0x3   :  { %s37_s10 = sshll.u32 %s782_s30, 4  ;;  %s25_s12 = sshll.u32 %s783_s11, 4  ;;  %s38_s10 = int_to_ptr.vmem [resolvable:$true] %s37_s10  ;;  %s26_s12 = int_to_ptr.vmem [resolvable:$true] %s25_s12 }
   0x4   :  { %s704_s13 = scalar_lea.vmem %s38_s10, 1024  ;;  %p709_p1 = scmp.lt.s32.totalorder %s38_s10, %s38_s10 }
   0x5   :  { %p705_p0 = scmp.ne.s32.totalorder %s38_s10, %s704_s13  ;;  %p710_p2 = scmp.lt.s32.totalorder %s704_s13, %s704_s13 }
   0x7   :  { %p711_p3 = por %p710_p2, %p709_p1 }
   0x9   :  { %p712_p4 = pnand %p711_p3, %p705_p0 }
   0xb   :  { %715 = shalt.err (!%p712_p4)
}
   0xc   :  { %s784_s14 = smov 64   ;;  %s785_s15 = smov 4  }
   0xd   :  { %43 = dma.hbm_to_vmem [thread:$0]  %s925_s2, 1024, %s38_s10, [#allocation6], %s784_s14, %s784_s14, %s785_s15  }
   0xe   :  { %s724_s18 = scalar_lea.vmem %s26_s12, 1024  ;;  %p729_p6 = scmp.lt.s32.totalorder %s26_s12, %s26_s12 }
   0xf   :  { %p725_p5 = scmp.ne.s32.totalorder %s26_s12, %s724_s18  ;;  %p730_p7 = scmp.lt.s32.totalorder %s724_s18, %s724_s18 }
  0x11   :  { %p731_p8 = por %p730_p7, %p729_p6 }
  0x13   :  { %p732_p9 = pnand %p731_p8, %p725_p5 }
  0x15   :  { %735 = shalt.err (!%p732_p9)
}
  0x16   :  { %31 = dma.hbm_to_vmem [thread:$0]  %s924_s1, 1024, %s26_s12, [#allocation3], %s784_s14, %s784_s14, %s785_s15  }
  0x17   :  { %s786_s21 = smov [#allocation7]  }
  0x18   :  { %s49_s22 = sshll.u32 %s786_s21, 4  ;;  %s50_s22 = int_to_ptr.vmem [resolvable:$true] %s49_s22 }
  0x19   :  { %s744_s23 = scalar_lea.vmem %s50_s22, 1024  ;;  %p749_p11 = scmp.lt.s32.totalorder %s50_s22, %s50_s22 }
  0x1a   :  { %p745_p10 = scmp.ne.s32.totalorder %s50_s22, %s744_s23  ;;  %p750_p12 = scmp.lt.s32.totalorder %s744_s23, %s744_s23 }
  0x1c   :  { %p751_p13 = por %p750_p12, %p749_p11 }
  0x1e   :  { %p752_p0 = pnand %p751_p13, %p745_p10 }
  0x20   :  { %755 = shalt.err (!%p752_p0)
}
  0x21   :  { %55 = dma.hbm_to_vmem [thread:$0]  %s926_s3, 1024, %s50_s22, [#allocation6], %s784_s14, %s784_s14, %s785_s15  }
  0x22   :  { %776 = dma.done.wait [#allocation3], 1024  }
  0x23   :  { %777 = vsyncadd [#allocation3], 4294966272 }
  0x24   :  { %778 = dma.done.wait [#allocation6], 2048  }
  0x25   :  { %779 = vsyncadd [#allocation6], 4294965248  ;;  %v787_v0 = vmov 0   ;;  %v788_v1 = vmov 0.0   ;;  %v74_v2 = vld [vmem:[%s923_s0] sm:$0xff]  ;;  %v660_v3 = vld [vmem:[#allocation2 + $0x38] sm:$0xff]   ;;  %v76_v18 = vlaneseq }
  0x26   :  { %659 = vset.pattern.permute.xlu0 %v787_v0  ;;  %587 = vmatprep.subr.bf16.mxu0 %v788_v1  ;;  %v75_v4 = vld [vmem:[%s923_s0 + $0x8] sm:$0xff]  ;;  %vm789_vm0 = vmmov 0   ;;  %v661_v5 = vld [vmem:[#allocation2 + $0x30] sm:$0xff]   ;;  %v668_v7 = vld [vmem:[#allocation5 + $0x38] sm:$0xff]   ;;  %v790_v22 = vmov 1.0|1.0  }
  0x27   :  { %607 = vmatprep.subr.bf16.mxu1 %v788_v1  ;;  %79 = vperm.xlu0 %659, %v74_v2   ;;  %v662_v6 = vld [vmem:[#allocation2 + $0x28] sm:$0xff]   ;;  %v669_v8 = vld [vmem:[#allocation5 + $0x30] sm:$0xff]   ;;  %v663_v9 = vld [vmem:[#allocation2 + $0x20] sm:$0xff]   ;;  %v77_v20 = vand.u32 127, %v76_v18  ;;  %s791_s11 = smov [#allocation8]  }
  0x28   :  { %603 = vmatprep.mubr.msk.bf16.mxu0 %vm789_vm0, %v788_v1  ;;  %623 = vmatprep.mubr.msk.bf16.mxu1 %vm789_vm0, %v788_v1  ;;  %v664_v10 = vld [vmem:[#allocation2 + $0x18] sm:$0xff]   ;;  %v670_v11 = vld [vmem:[#allocation5 + $0x28] sm:$0xff]   ;;  %v671_v12 = vld [vmem:[#allocation5 + $0x20] sm:$0xff]   ;;  %s508_s12 = sshll.u32 %s791_s11, 4  ;;  %s509_s12 = int_to_ptr.vmem [resolvable:$true] %s508_s12 }
  0x29   :  { %588 = vmatpush3.bf16.msra.mxu0 %v660_v3  ;;  %608 = vmatpush3.bf16.msra.mxu1 %v668_v7  ;;  %v665_v13 = vld [vmem:[#allocation2 + $0x10] sm:$0xff]   ;;  %v672_v14 = vld [vmem:[#allocation5 + $0x18] sm:$0xff]   ;;  %v666_v15 = vld [vmem:[#allocation2 + $0x8] sm:$0xff]   ;;  %vm424_vm4 = vcmp.lt.s32.totalorder %v77_v20, 96  ;;  %s756_s13 = scalar_lea.vmem %s509_s12, 256  ;;  %p761_p2 = scmp.lt.s32.totalorder %s509_s12, %s509_s12 }
  0x2a   :  { %589 = vmatprep.subr.bf16.mxu0 %v788_v1  ;;  %609 = vmatprep.subr.bf16.mxu1 %v788_v1  ;;  %v673_v16 = vld [vmem:[#allocation5 + $0x10] sm:$0xff]   ;;  %v667_v17 = vld [vmem:[#allocation2] sm:$0xff]   ;;  %v674_v23 = vld [vmem:[#allocation5 + $0x8] sm:$0xff]   ;;  %v555_v45 = vsel %vm424_vm4, 1.0, %v788_v1  ;;  %p757_p1 = scmp.ne.s32.totalorder %s509_s12, %s756_s13  ;;  %p762_p3 = scmp.lt.s32.totalorder %s756_s13, %s756_s13 }
  0x2b   :  { %82 = vperm.xlu0 %659, %v75_v4   ;;  %v675_v24 = vld [vmem:[#allocation5] sm:$0xff]   ;;  %v676_v25 = vld [vmem:[#allocation7 + $0x38] sm:$0xff]   ;;  %v677_v26 = vld [vmem:[#allocation7 + $0x30] sm:$0xff]  }
  0x2c   :  { %v678_v32 = vld [vmem:[#allocation7 + $0x28] sm:$0xff]   ;;  %v679_v33 = vld [vmem:[#allocation7 + $0x20] sm:$0xff]   ;;  %v680_v34 = vld [vmem:[#allocation7 + $0x18] sm:$0xff]   ;;  %p763_p4 = por %p762_p3, %p761_p2 }
  0x2d   :  { %590 = vmatpush3.bf16.msra.mxu0 %v661_v5  ;;  %610 = vmatpush3.bf16.msra.mxu1 %v669_v8  ;;  %v681_v35 = vld [vmem:[#allocation7 + $0x10] sm:$0xff]   ;;  %v682_v36 = vld [vmem:[#allocation7 + $0x8] sm:$0xff]   ;;  %v683_v37 = vld [vmem:[#allocation7] sm:$0xff]  }
  0x2e   :  { %591 = vmatprep.subr.bf16.mxu0 %v788_v1  ;;  %611 = vmatprep.subr.bf16.mxu1 %v788_v1  ;;  %v537_v38 = vld [vmem:[%s927_s4] ss:$0 sm:$0xff]  ;;  %p764_p5 = pnand %p763_p4, %p757_p1 }
  0x2f   :  { %v546_v63 = vld [vmem:[%s928_s5] ss:$0 sm:$0xff] }
  0x31   :  { %592 = vmatpush3.bf16.msra.mxu0 %v662_v6  ;;  %612 = vmatpush3.bf16.msra.mxu1 %v670_v11 }
  0x32   :  { %593 = vmatprep.subr.bf16.mxu0 %v788_v1  ;;  %613 = vmatprep.subr.bf16.mxu1 %v788_v1 }
  0x35   :  { %594 = vmatpush3.bf16.msra.mxu0 %v663_v9  ;;  %614 = vmatpush3.bf16.msra.mxu1 %v671_v12 }
  0x36   :  { %595 = vmatprep.subr.bf16.mxu0 %v788_v1  ;;  %615 = vmatprep.subr.bf16.mxu1 %v788_v1 }
  0x39   :  { %596 = vmatpush3.bf16.msra.mxu0 %v664_v10  ;;  %616 = vmatpush3.bf16.msra.mxu1 %v672_v14 }
  0x3a   :  { %597 = vmatprep.subr.bf16.mxu0 %v788_v1  ;;  %617 = vmatprep.subr.bf16.mxu1 %v788_v1 }
  0x3d   :  { %598 = vmatpush3.bf16.msra.mxu0 %v665_v13  ;;  %618 = vmatpush3.bf16.msra.mxu1 %v673_v16 }
  0x3e   :  { %599 = vmatprep.subr.bf16.mxu0 %v788_v1  ;;  %619 = vmatprep.subr.bf16.mxu1 %v788_v1 }
  0x41   :  { %600 = vmatpush3.bf16.msra.mxu0 %v666_v15  ;;  %620 = vmatpush3.bf16.msra.mxu1 %v674_v23 }
  0x42   :  { %601 = vmatprep.subr.bf16.mxu0 %v788_v1  ;;  %621 = vmatprep.subr.bf16.mxu1 %v788_v1 }
  0x45   :  { %602 = vmatpush3.bf16.msra.mxu0 %v667_v17  ;;  %622 = vmatpush3.bf16.msra.mxu1 %v675_v24 }
  0x46   :  { %627 = vmatprep.subr.bf16.mxu0 %v788_v1 }
  0xa2   :  { %v80_v19 = vpop.permute.xlu0 %79 }
  0xa3   :  { %vm84_vm1 = vcmp.eq.s32.totalorder %v77_v20, %v80_v19  ;;  %v556_v19 = vld [vmem:[%s929_s6] ss:$0 sm:$0xff] }
  0xa6   :  { %v83_v21 = vpop.permute.xlu0 %82 }
  0xa7   :  { %vm85_vm2 = vcmp.eq.s32.totalorder %v77_v20, %v83_v21  ;;  %v557_v21 = vld [vmem:[%s930_s7] ss:$0 sm:$0xff] }
  0xa8   :  { %vm535_vm3 = vmpackc.low %vm85_vm2, %vm84_vm1 }
  0xa9   :  { %604 = vmatmul.mubr.msk.bf16.vlgmr.msra.gmra.mxu0 %vm535_vm3, %v790_v22 }
  0xaa   :  { %643 = vmatprep.mubr.msk.bf16.mxu0 %vm789_vm0, %v788_v1  ;;  %628 = vmatpush3.bf16.msra.mxu0 %v676_v25 }
  0xab   :  { %629 = vmatprep.subr.bf16.mxu0 %v788_v1 }
  0xae   :  { %630 = vmatpush3.bf16.msra.mxu0 %v677_v26 }
  0xaf   :  { %631 = vmatprep.subr.bf16.mxu0 %v788_v1 }
  0xb2   :  { %632 = vmatpush3.bf16.msra.mxu0 %v678_v32 }
  0xb3   :  { %633 = vmatprep.subr.bf16.mxu0 %v788_v1 }
  0xb6   :  { %634 = vmatpush3.bf16.msra.mxu0 %v679_v33 }
  0xb7   :  { %635 = vmatprep.subr.bf16.mxu0 %v788_v1 }
  0xba   :  { %636 = vmatpush3.bf16.msra.mxu0 %v680_v34 }
  0xbb   :  { %637 = vmatprep.subr.bf16.mxu0 %v788_v1 }
  0xbe   :  { %638 = vmatpush3.bf16.msra.mxu0 %v681_v35 }
  0xbf   :  { %639 = vmatprep.subr.bf16.mxu0 %v788_v1 }
  0xc2   :  { %640 = vmatpush3.bf16.msra.mxu0 %v682_v36 }
  0xc3   :  { %641 = vmatprep.subr.bf16.mxu0 %v788_v1 }
  0xc6   :  { %642 = vmatpush3.bf16.msra.mxu0 %v683_v37 }
 0x169   :  { %v884_v27 = vpop.f32.mrf.mxu0 }
 0x16a   :  { %vm474_vm5 = vcmp.ne.f32.partialorder %v884_v27, 0.0 }
 0x16b   :  { %v605_v28 = vpop.f32.mrf.mxu0  ;;  %v558_v61 = vsel %vm474_vm5, 1.0, %v788_v1 }
 0x16d   :  { %v886_v29 = vpop.f32.mrf.mxu0 }
 0x16e   :  { %v196_v30 = vpack.c.bf16 %v886_v29, %v884_v27  ;;  %vm475_vm6 = vcmp.ne.f32.partialorder %v886_v29, 0.0 }
 0x16f   :  { %v606_v31 = vpop.f32.mrf.mxu0  ;;  %v559_v62 = vsel %vm475_vm6, 1.0, %v788_v1 }
 0x170   :  { %624 = vmatmul.mubr.bf16.vlgmr.msra.gmra.mxu1 %v196_v30 }
 0x230   :  { %v302_v39 = vpop.f32.mrf.mxu1 }
 0x231   :  { %v303_v40 = vadd.f32 %v537_v38, %v302_v39 }
 0x232   :  { %v625_v41 = vpop.f32.mrf.mxu1 }
 0x233   :  { %684 = vtanh.f32 %v303_v40 }
 0x234   :  { %v305_v42 = vpop.f32.mrf.mxu1 }
 0x235   :  { %v306_v43 = vadd.f32 %v537_v38, %v305_v42 }
 0x236   :  { %v626_v44 = vpop.f32.mrf.mxu1 }
 0x237   :  { %686 = vtanh.f32 %v306_v43 }
 0x240   :  { %v685_v46 = vpop.eup %684 }
 0x241   :  { %v427_v47 = vmul.f32 %v685_v46, %v555_v45 }
 0x243   :  { %429 = vadd.xlane.f32.xlu1 %v427_v47 }
 0x244   :  { %v687_v48 = vpop.eup %686 }
 0x245   :  { %v428_v49 = vmul.f32 %v687_v48, %v555_v45  ;;  %v311_v50 = vpack.c.bf16 %v687_v48, %v685_v46 }
 0x247   :  { %431 = vadd.xlane.f32.xlu1 %v428_v49  ;;  %644 = vmatmul.mubr.bf16.vlgmr.msra.gmra.mxu0 %v311_v50 }
 0x2cc   :  { %v430_v51 = vpop.xlane.xlu1 %429 }
 0x2cd   :  { %v434_v52 = vmul.f32 0.010416667, %v430_v51 }
 0x2cf   :  { %v436_v53 = vsub.f32 %v685_v46, %v434_v52 }
 0x2d0   :  { %v432_v54 = vpop.xlane.xlu1 %431 }
 0x2d1   :  { %v435_v55 = vmul.f32 0.010416667, %v432_v54  ;;  %v438_v56 = vmul.f32 %v555_v45, %v436_v53 }
 0x2d3   :  { %v437_v57 = vsub.f32 %v687_v48, %v435_v55  ;;  %v440_v58 = vmul.f32 %v438_v56, %v438_v56 }
 0x2d5   :  { %442 = vadd.xlane.f32.xlu0 %v440_v58  ;;  %v439_v59 = vmul.f32 %v555_v45, %v437_v57 }
 0x2d7   :  { %v441_v60 = vmul.f32 %v439_v59, %v439_v59 }
 0x2d9   :  { %444 = vadd.xlane.f32.xlu1 %v441_v60 }
 0x2dd   :  { %490 = vadd.xlane.f32.xlu1 %v558_v61 }
 0x2e1   :  { %492 = vadd.xlane.f32.xlu1 %v559_v62 }
 0x307   :  { %v417_v0 = vpop.f32.mrf.mxu0 }
 0x308   :  { %v418_v2 = vadd.f32 %v546_v63, %v417_v0 }
 0x309   :  { %v645_v3 = vpop.f32.mrf.mxu0 }
 0x30a   :  { %v480_v4 = vsub.f32 %v884_v27, %v418_v2 }
 0x30b   :  { %v420_v5 = vpop.f32.mrf.mxu0 }
 0x30c   :  { %v421_v6 = vadd.f32 %v546_v63, %v420_v5  ;;  %v482_v7 = vmul.f32 %v558_v61, %v480_v4 }
 0x30d   :  { %v646_v8 = vpop.f32.mrf.mxu0 }
 0x30e   :  { %v481_v9 = vsub.f32 %v886_v29, %v421_v6  ;;  %v484_v10 = vmul.f32 %v482_v7, %v482_v7 }
 0x310   :  { %486 = vadd.xlane.f32.xlu1 %v484_v10  ;;  %v483_v11 = vmul.f32 %v559_v62, %v481_v9 }
 0x312   :  { %v485_v1 = vmul.f32 %v483_v11, %v483_v11 }
 0x314   :  { %488 = vadd.xlane.f32.xlu1 %v485_v1 }
 0x35e   :  { %v443_v12 = vpop.xlane.xlu0 %442 }
 0x35f   :  { %v446_v13 = vmul.f32 0.010416667, %v443_v12 }
 0x361   :  { %v448_v14 = vadd.f32 1e-05, %v446_v13 }
 0x362   :  { %v445_v15 = vpop.xlane.xlu1 %444 }
 0x363   :  { %688 = vrsqrt.f32 %v448_v14  ;;  %v447_v16 = vmul.f32 0.010416667, %v445_v15 }
 0x365   :  { %v449_v17 = vadd.f32 1e-05, %v447_v16 }
 0x367   :  { %690 = vrsqrt.f32 %v449_v17 }
 0x370   :  { %v689_v18 = vpop.eup %688 }
 0x371   :  { %v452_v20 = vmul.f32 %v689_v18, %v436_v53 }
 0x373   :  { %v461_v22 = vmul.f32 %v556_v19, %v452_v20 }
 0x374   :  { %v691_v23 = vpop.eup %690 }
 0x375   :  { %v453_v24 = vmul.f32 %v691_v23, %v437_v57  ;;  %v470_v25 = vadd.f32 %v557_v21, %v461_v22 }
 0x377   :  { %v462_v26 = vmul.f32 %v556_v19, %v453_v24  ;;  %472 = vst [vmem:[#allocation8] sm:$0xff] %v470_v25 }
 0x379   :  { %v471_v27 = vadd.f32 %v557_v21, %v462_v26 }
 0x37b   :  { %473 = vst [vmem:[#allocation8 + $0x8] sm:$0xff] %v471_v27 }
 0x37c   :  { %767 = shalt.err (!%p764_p5)
}
 0x37d   :  { %s792_s6 = smov 128   ;;  %s793_s7 = smov 8   ;;  %v491_v28 = vpop.xlane.xlu1 %490  ;;  %vm500_vm7 = vcmask 7168  }
 0x37e   :  { %514 = dma.vmem_to_hbm [thread:$0]  %s509_s12, 256, %s931_s8, [#allocation4], %s792_s6, %s792_s6, %s793_s7   ;;  %v494_v29 = vmax.f32 %v491_v28, 1.0 }
 0x380   :  { %692 = vrcp.f32 %v494_v29 }
 0x381   :  { %v493_v30 = vpop.xlane.xlu1 %492 }
 0x382   :  { %v495_v31 = vmax.f32 %v493_v30, 1.0 }
 0x384   :  { %694 = vrcp.f32 %v495_v31 }
 0x38d   :  { %v693_v32 = vpop.eup %692 }
 0x391   :  { %v695_v35 = vpop.eup %694 }
 0x399   :  { %v487_v33 = vpop.xlane.xlu1 %486 }
 0x39a   :  { %v497_v34 = vmul.f32 %v693_v32, %v487_v33 }
 0x39c   :  { %501 = vst.msk [vmem:[%s932_s9] sm:$0xff] %vm500_vm7, %v497_v34 }
 0x39d   :  { %v489_v36 = vpop.xlane.xlu1 %488 }
 0x39e   :  { %v499_v37 = vmul.f32 %v695_v35, %v489_v36 }
 0x3a0   :  { %502 = vst.msk [vmem:[%s932_s9 + $0x8] sm:$0xff] %vm500_vm7, %v499_v37 }
 0x3a1   :  { %780 = dma.done.wait [#allocation4], 256  }
 0x3a2   :  { %781 = vsyncadd [#allocation4], 4294967040 }
 0x3a3   :  { %522 = vsyncpa [#allocation3], 1 }
 0x3a4   :  { %523 = vsyncpa [#allocation6], 1 }
 0x3a5   :  { %524 = vsyncpa [#allocation4], 1 }

// kernel: tpu_custom_call.1
= control target key start
LH: loop header
LB: loop body
LE: loop exit
PB: predicated region body
PF: predicated region fallthrough
CT: control target
= control target key end

     0   :  { %15 = vsyncpa [#allocation3], 0  ;;  %s923_s0 = inlined_call_operand.vmem [shape: s32[16,1], index: 0, kind: input, shape index: {}]   ;;  %s924_s1 = inlined_call_operand.hbm [shape: bf16[128,128], index: 1, kind: input, shape index: {}]   ;;  %s925_s2 = inlined_call_operand.hbm [shape: bf16[128,128], index: 2, kind: input, shape index: {}]   ;;  %s926_s3 = inlined_call_operand.hbm [shape: bf16[128,128], index: 3, kind: input, shape index: {}]   ;;  %s927_s4 = inlined_call_operand.vmem [shape: f32[1,128], index: 4, kind: input, shape index: {}]   ;;  %s928_s5 = inlined_call_operand.vmem [shape: f32[1,128], index: 5, kind: input, shape index: {}]   ;;  %s929_s6 = inlined_call_operand.vmem [shape: f32[1,128], index: 6, kind: input, shape index: {}]   ;;  %s930_s7 = inlined_call_operand.vmem [shape: f32[1,128], index: 7, kind: input, shape index: {}]   ;;  %s931_s8 = inlined_call_operand.hbm [shape: f32[16,128], index: 8, kind: output, shape index: {0}]   ;;  %s932_s9 = inlined_call_operand.vmem [shape: f32[16,1], index: 9, kind: output, shape index: {1}]  }
   0x1   :  { %16 = vsyncpa [#allocation6], 0 }
   0x2   :  { %17 = vsyncpa [#allocation4], 0  ;;  %s782_s30 = smov [#allocation5]   ;;  %s783_s11 = smov [#allocation2]  }
   0x3   :  { %s37_s10 = sshll.u32 %s782_s30, 4  ;;  %s25_s12 = sshll.u32 %s783_s11, 4  ;;  %s38_s10 = int_to_ptr.vmem [resolvable:$true] %s37_s10  ;;  %s26_s12 = int_to_ptr.vmem [resolvable:$true] %s25_s12 }
   0x4   :  { %s704_s13 = scalar_lea.vmem %s38_s10, 1024  ;;  %p709_p1 = scmp.lt.s32.totalorder %s38_s10, %s38_s10 }
   0x5   :  { %p705_p0 = scmp.ne.s32.totalorder %s38_s10, %s704_s13  ;;  %p710_p2 = scmp.lt.s32.totalorder %s704_s13, %s704_s13 }
   0x7   :  { %p711_p3 = por %p710_p2, %p709_p1 }
   0x9   :  { %p712_p4 = pnand %p711_p3, %p705_p0 }
   0xb   :  { %715 = shalt.err (!%p712_p4)
}
   0xc   :  { %s784_s14 = smov 64   ;;  %s785_s15 = smov 4  }
   0xd   :  { %43 = dma.hbm_to_vmem [thread:$0]  %s925_s2, 1024, %s38_s10, [#allocation6], %s784_s14, %s784_s14, %s785_s15  }
   0xe   :  { %s724_s18 = scalar_lea.vmem %s26_s12, 1024  ;;  %p729_p6 = scmp.lt.s32.totalorder %s26_s12, %s26_s12 }
   0xf   :  { %p725_p5 = scmp.ne.s32.totalorder %s26_s12, %s724_s18  ;;  %p730_p7 = scmp.lt.s32.totalorder %s724_s18, %s724_s18 }
  0x11   :  { %p731_p8 = por %p730_p7, %p729_p6 }
  0x13   :  { %p732_p9 = pnand %p731_p8, %p725_p5 }
  0x15   :  { %735 = shalt.err (!%p732_p9)
}
  0x16   :  { %31 = dma.hbm_to_vmem [thread:$0]  %s924_s1, 1024, %s26_s12, [#allocation3], %s784_s14, %s784_s14, %s785_s15  }
  0x17   :  { %s786_s21 = smov [#allocation7]  }
  0x18   :  { %s49_s22 = sshll.u32 %s786_s21, 4  ;;  %s50_s22 = int_to_ptr.vmem [resolvable:$true] %s49_s22 }
  0x19   :  { %s744_s23 = scalar_lea.vmem %s50_s22, 1024  ;;  %p749_p11 = scmp.lt.s32.totalorder %s50_s22, %s50_s22 }
  0x1a   :  { %p745_p10 = scmp.ne.s32.totalorder %s50_s22, %s744_s23  ;;  %p750_p12 = scmp.lt.s32.totalorder %s744_s23, %s744_s23 }
  0x1c   :  { %p751_p13 = por %p750_p12, %p749_p11 }
  0x1e   :  { %p752_p0 = pnand %p751_p13, %p745_p10 }
  0x20   :  { %755 = shalt.err (!%p752_p0)
}
  0x21   :  { %55 = dma.hbm_to_vmem [thread:$0]  %s926_s3, 1024, %s50_s22, [#allocation6], %s784_s14, %s784_s14, %s785_s15  }
  0x22   :  { %776 = dma.done.wait [#allocation3], 1024  }
  0x23   :  { %777 = vsyncadd [#allocation3], 4294966272 }
  0x24   :  { %778 = dma.done.wait [#allocation6], 2048  }
  0x25   :  { %779 = vsyncadd [#allocation6], 4294965248  ;;  %v787_v0 = vmov 0   ;;  %v788_v1 = vmov 0.0   ;;  %v74_v2 = vld [vmem:[%s923_s0] sm:$0xff]  ;;  %v660_v3 = vld [vmem:[#allocation2 + $0x38] sm:$0xff]   ;;  %v76_v18 = vlaneseq }
  0x26   :  { %659 = vset.pattern.permute.xlu0 %v787_v0  ;;  %587 = vmatprep.subr.bf16.mxu0 %v788_v1  ;;  %v75_v4 = vld [vmem:[%s923_s0 + $0x8] sm:$0xff]  ;;  %vm789_vm0 = vmmov 0   ;;  %v661_v5 = vld [vmem:[#allocation2 + $0x30] sm:$0xff]   ;;  %v668_v7 = vld [vmem:[#allocation5 + $0x38] sm:$0xff]   ;;  %v790_v22 = vmov 1.0|1.0  }
  0x27   :  { %607 = vmatprep.subr.bf16.mxu1 %v788_v1  ;;  %79 = vperm.xlu0 %659, %v74_v2   ;;  %v662_v6 = vld [vmem:[#allocation2 + $0x28] sm:$0xff]   ;;  %v669_v8 = vld [vmem:[#allocation5 + $0x30] sm:$0xff]   ;;  %v663_v9 = vld [vmem:[#allocation2 + $0x20] sm:$0xff]   ;;  %v77_v20 = vand.u32 127, %v76_v18  ;;  %s791_s11 = smov [#allocation8]  }
  0x28   :  { %603 = vmatprep.mubr.msk.bf16.mxu0 %vm789_vm0, %v788_v1  ;;  %623 = vmatprep.mubr.msk.bf16.mxu1 %vm789_vm0, %v788_v1  ;;  %v664_v10 = vld [vmem:[#allocation2 + $0x18] sm:$0xff]   ;;  %v670_v11 = vld [vmem:[#allocation5 + $0x28] sm:$0xff]   ;;  %v671_v12 = vld [vmem:[#allocation5 + $0x20] sm:$0xff]   ;;  %s508_s12 = sshll.u32 %s791_s11, 4  ;;  %s509_s12 = int_to_ptr.vmem [resolvable:$true] %s508_s12 }
  0x29   :  { %588 = vmatpush3.bf16.msra.mxu0 %v660_v3  ;;  %608 = vmatpush3.bf16.msra.mxu1 %v668_v7  ;;  %v665_v13 = vld [vmem:[#allocation2 + $0x10] sm:$0xff]   ;;  %v672_v14 = vld [vmem:[#allocation5 + $0x18] sm:$0xff]   ;;  %v666_v15 = vld [vmem:[#allocation2 + $0x8] sm:$0xff]   ;;  %vm424_vm4 = vcmp.lt.s32.totalorder %v77_v20, 96  ;;  %s756_s13 = scalar_lea.vmem %s509_s12, 256  ;;  %p761_p2 = scmp.lt.s32.totalorder %s509_s12, %s509_s12 }
  0x2a   :  { %589 = vmatprep.subr.bf16.mxu0 %v788_v1  ;;  %609 = vmatprep.subr.bf16.mxu1 %v788_v1  ;;  %v673_v16 = vld [vmem:[#allocation5 + $0x10] sm:$0xff]   ;;  %v667_v17 = vld [vmem:[#allocation2] sm:$0xff]   ;;  %v674_v23 = vld [vmem:[#allocation5 + $0x8] sm:$0xff]   ;;  %v555_v45 = vsel %vm424_vm4, 1.0, %v788_v1  ;;  %p757_p1 = scmp.ne.s32.totalorder %s509_s12, %s756_s13  ;;  %p762_p3 = scmp.lt.s32.totalorder %s756_s13, %s756_s13 }
  0x2b   :  { %82 = vperm.xlu0 %659, %v75_v4   ;;  %v675_v24 = vld [vmem:[#allocation5] sm:$0xff]   ;;  %v676_v25 = vld [vmem:[#allocation7 + $0x38] sm:$0xff]   ;;  %v677_v26 = vld [vmem:[#allocation7 + $0x30] sm:$0xff]  }
  0x2c   :  { %v678_v32 = vld [vmem:[#allocation7 + $0x28] sm:$0xff]   ;;  %v679_v33 = vld [vmem:[#allocation7 + $0x20] sm:$0xff]   ;;  %v680_v34 = vld [vmem:[#allocation7 + $0x18] sm:$0xff]   ;;  %p763_p4 = por %p762_p3, %p761_p2 }
  0x2d   :  { %590 = vmatpush3.bf16.msra.mxu0 %v661_v5  ;;  %610 = vmatpush3.bf16.msra.mxu1 %v669_v8  ;;  %v681_v35 = vld [vmem:[#allocation7 + $0x10] sm:$0xff]   ;;  %v682_v36 = vld [vmem:[#allocation7 + $0x8] sm:$0xff]   ;;  %v683_v37 = vld [vmem:[#allocation7] sm:$0xff]  }
  0x2e   :  { %591 = vmatprep.subr.bf16.mxu0 %v788_v1  ;;  %611 = vmatprep.subr.bf16.mxu1 %v788_v1  ;;  %v537_v38 = vld [vmem:[%s927_s4] ss:$0 sm:$0xff]  ;;  %p764_p5 = pnand %p763_p4, %p757_p1 }
  0x2f   :  { %v546_v63 = vld [vmem:[%s928_s5] ss:$0 sm:$0xff] }
  0x31   :  { %592 = vmatpush3.bf16.msra.mxu0 %v662_v6  ;;  %612 = vmatpush3.bf16.msra.mxu1 %v670_v11 }
  0x32   :  { %593 = vmatprep.subr.bf16.mxu0 %v788_v1  ;;  %613 = vmatprep.subr.bf16.mxu1 %v788_v1 }
  0x35   :  { %594 = vmatpush3.bf16.msra.mxu0 %v663_v9  ;;  %614 = vmatpush3.bf16.msra.mxu1 %v671_v12 }
  0x36   :  { %595 = vmatprep.subr.bf16.mxu0 %v788_v1  ;;  %615 = vmatprep.subr.bf16.mxu1 %v788_v1 }
  0x39   :  { %596 = vmatpush3.bf16.msra.mxu0 %v664_v10  ;;  %616 = vmatpush3.bf16.msra.mxu1 %v672_v14 }
  0x3a   :  { %597 = vmatprep.subr.bf16.mxu0 %v788_v1  ;;  %617 = vmatprep.subr.bf16.mxu1 %v788_v1 }
  0x3d   :  { %598 = vmatpush3.bf16.msra.mxu0 %v665_v13  ;;  %618 = vmatpush3.bf16.msra.mxu1 %v673_v16 }
  0x3e   :  { %599 = vmatprep.subr.bf16.mxu0 %v788_v1  ;;  %619 = vmatprep.subr.bf16.mxu1 %v788_v1 }
  0x41   :  { %600 = vmatpush3.bf16.msra.mxu0 %v666_v15  ;;  %620 = vmatpush3.bf16.msra.mxu1 %v674_v23 }
  0x42   :  { %601 = vmatprep.subr.bf16.mxu0 %v788_v1  ;;  %621 = vmatprep.subr.bf16.mxu1 %v788_v1 }
  0x45   :  { %602 = vmatpush3.bf16.msra.mxu0 %v667_v17  ;;  %622 = vmatpush3.bf16.msra.mxu1 %v675_v24 }
  0x46   :  { %627 = vmatprep.subr.bf16.mxu0 %v788_v1 }
  0xa2   :  { %v80_v19 = vpop.permute.xlu0 %79 }
  0xa3   :  { %vm84_vm1 = vcmp.eq.s32.totalorder %v77_v20, %v80_v19  ;;  %v556_v19 = vld [vmem:[%s929_s6] ss:$0 sm:$0xff] }
  0xa6   :  { %v83_v21 = vpop.permute.xlu0 %82 }
  0xa7   :  { %vm85_vm2 = vcmp.eq.s32.totalorder %v77_v20, %v83_v21  ;;  %v557_v21 = vld [vmem:[%s930_s7] ss:$0 sm:$0xff] }
  0xa8   :  { %vm535_vm3 = vmpackc.low %vm85_vm2, %vm84_vm1 }
  0xa9   :  { %604 = vmatmul.mubr.msk.bf16.vlgmr.msra.gmra.mxu0 %vm535_vm3, %v790_v22 }
  0xaa   :  { %643 = vmatprep.mubr.msk.bf16.mxu0 %vm789_vm0, %v788_v1  ;;  %628 = vmatpush3.bf16.msra.mxu0 %v676_v25 }
  0xab   :  { %629 = vmatprep.subr.bf16.mxu0 %v788_v1 }
  0xae   :  { %630 = vmatpush3.bf16.msra.mxu0 %v677_v26 }
  0xaf   :  { %631 = vmatprep.subr.bf16.mxu0 %v788_v1 }
  0xb2   :  { %632 = vmatpush3.bf16.msra.mxu0 %v678_v32 }
  0xb3   :  { %633 = vmatprep.subr.bf16.mxu0 %v788_v1 }
  0xb6   :  { %634 = vmatpush3.bf16.msra.mxu0 %v679_v33 }
  0xb7   :  { %635 = vmatprep.subr.bf16.mxu0 %v788_v1 }
  0xba   :  { %636 = vmatpush3.bf16.msra.mxu0 %v680_v34 }
  0xbb   :  { %637 = vmatprep.subr.bf16.mxu0 %v788_v1 }
  0xbe   :  { %638 = vmatpush3.bf16.msra.mxu0 %v681_v35 }
  0xbf   :  { %639 = vmatprep.subr.bf16.mxu0 %v788_v1 }
  0xc2   :  { %640 = vmatpush3.bf16.msra.mxu0 %v682_v36 }
  0xc3   :  { %641 = vmatprep.subr.bf16.mxu0 %v788_v1 }
  0xc6   :  { %642 = vmatpush3.bf16.msra.mxu0 %v683_v37 }
 0x169   :  { %v884_v27 = vpop.f32.mrf.mxu0 }
 0x16a   :  { %vm474_vm5 = vcmp.ne.f32.partialorder %v884_v27, 0.0 }
 0x16b   :  { %v605_v28 = vpop.f32.mrf.mxu0  ;;  %v558_v61 = vsel %vm474_vm5, 1.0, %v788_v1 }
 0x16d   :  { %v886_v29 = vpop.f32.mrf.mxu0 }
 0x16e   :  { %v196_v30 = vpack.c.bf16 %v886_v29, %v884_v27  ;;  %vm475_vm6 = vcmp.ne.f32.partialorder %v886_v29, 0.0 }
 0x16f   :  { %v606_v31 = vpop.f32.mrf.mxu0  ;;  %v559_v62 = vsel %vm475_vm6, 1.0, %v788_v1 }
 0x170   :  { %624 = vmatmul.mubr.bf16.vlgmr.msra.gmra.mxu1 %v196_v30 }
 0x230   :  { %v302_v39 = vpop.f32.mrf.mxu1 }
 0x231   :  { %v303_v40 = vadd.f32 %v537_v38, %v302_v39 }
 0x232   :  { %v625_v41 = vpop.f32.mrf.mxu1 }
 0x233   :  { %684 = vtanh.f32 %v303_v40 }
 0x234   :  { %v305_v42 = vpop.f32.mrf.mxu1 }
 0x235   :  { %v306_v43 = vadd.f32 %v537_v38, %v305_v42 }
 0x236   :  { %v626_v44 = vpop.f32.mrf.mxu1 }
 0x237   :  { %686 = vtanh.f32 %v306_v43 }
 0x240   :  { %v685_v46 = vpop.eup %684 }
 0x241   :  { %v427_v47 = vmul.f32 %v685_v46, %v555_v45 }
 0x243   :  { %429 = vadd.xlane.f32.xlu1 %v427_v47 }
 0x244   :  { %v687_v48 = vpop.eup %686 }
 0x245   :  { %v428_v49 = vmul.f32 %v687_v48, %v555_v45  ;;  %v311_v50 = vpack.c.bf16 %v687_v48, %v685_v46 }
 0x247   :  { %431 = vadd.xlane.f32.xlu1 %v428_v49  ;;  %644 = vmatmul.mubr.bf16.vlgmr.msra.gmra.mxu0 %v311_v50 }
 0x2cc   :  { %v430_v51 = vpop.xlane.xlu1 %429 }
 0x2cd   :  { %v434_v52 = vmul.f32 0.010416667, %v430_v51 }
 0x2cf   :  { %v436_v53 = vsub.f32 %v685_v46, %v434_v52 }
 0x2d0   :  { %v432_v54 = vpop.xlane.xlu1 %431 }
 0x2d1   :  { %v435_v55 = vmul.f32 0.010416667, %v432_v54  ;;  %v438_v56 = vmul.f32 %v555_v45, %v436_v53 }
 0x2d3   :  { %v437_v57 = vsub.f32 %v687_v48, %v435_v55  ;;  %v440_v58 = vmul.f32 %v438_v56, %v438_v56 }
 0x2d5   :  { %442 = vadd.xlane.f32.xlu0 %v440_v58  ;;  %v439_v59 = vmul.f32 %v555_v45, %v437_v57 }
 0x2d7   :  { %v441_v60 = vmul.f32 %v439_v59, %v439_v59 }
 0x2d9   :  { %444 = vadd.xlane.f32.xlu1 %v441_v60 }
 0x2dd   :  { %490 = vadd.xlane.f32.xlu1 %v558_v61 }
 0x2e1   :  { %492 = vadd.xlane.f32.xlu1 %v559_v62 }
 0x307   :  { %v417_v0 = vpop.f32.mrf.mxu0 }
 0x308   :  { %v418_v2 = vadd.f32 %v546_v63, %v417_v0 }
 0x309   :  { %v645_v3 = vpop.f32.mrf.mxu0 }
 0x30a   :  { %v480_v4 = vsub.f32 %v884_v27, %v418_v2 }
 0x30b   :  { %v420_v5 = vpop.f32.mrf.mxu0 }
 0x30c   :  { %v421_v6 = vadd.f32 %v546_v63, %v420_v5  ;;  %v482_v7 = vmul.f32 %v558_v61, %v480_v4 }
 0x30d   :  { %v646_v8 = vpop.f32.mrf.mxu0 }
 0x30e   :  { %v481_v9 = vsub.f32 %v886_v29, %v421_v6  ;;  %v484_v10 = vmul.f32 %v482_v7, %v482_v7 }
 0x310   :  { %486 = vadd.xlane.f32.xlu1 %v484_v10  ;;  %v483_v11 = vmul.f32 %v559_v62, %v481_v9 }
 0x312   :  { %v485_v1 = vmul.f32 %v483_v11, %v483_v11 }
 0x314   :  { %488 = vadd.xlane.f32.xlu1 %v485_v1 }
 0x35e   :  { %v443_v12 = vpop.xlane.xlu0 %442 }
 0x35f   :  { %v446_v13 = vmul.f32 0.010416667, %v443_v12 }
 0x361   :  { %v448_v14 = vadd.f32 1e-05, %v446_v13 }
 0x362   :  { %v445_v15 = vpop.xlane.xlu1 %444 }
 0x363   :  { %688 = vrsqrt.f32 %v448_v14  ;;  %v447_v16 = vmul.f32 0.010416667, %v445_v15 }
 0x365   :  { %v449_v17 = vadd.f32 1e-05, %v447_v16 }
 0x367   :  { %690 = vrsqrt.f32 %v449_v17 }
 0x370   :  { %v689_v18 = vpop.eup %688 }
 0x371   :  { %v452_v20 = vmul.f32 %v689_v18, %v436_v53 }
 0x373   :  { %v461_v22 = vmul.f32 %v556_v19, %v452_v20 }
 0x374   :  { %v691_v23 = vpop.eup %690 }
 0x375   :  { %v453_v24 = vmul.f32 %v691_v23, %v437_v57  ;;  %v470_v25 = vadd.f32 %v557_v21, %v461_v22 }
 0x377   :  { %v462_v26 = vmul.f32 %v556_v19, %v453_v24  ;;  %472 = vst [vmem:[#allocation8] sm:$0xff] %v470_v25 }
 0x379   :  { %v471_v27 = vadd.f32 %v557_v21, %v462_v26 }
 0x37b   :  { %473 = vst [vmem:[#allocation8 + $0x8] sm:$0xff] %v471_v27 }
 0x37c   :  { %767 = shalt.err (!%p764_p5)
}
 0x37d   :  { %s792_s6 = smov 128   ;;  %s793_s7 = smov 8   ;;  %v491_v28 = vpop.xlane.xlu1 %490  ;;  %vm500_vm7 = vcmask 7168  }
 0x37e   :  { %514 = dma.vmem_to_hbm [thread:$0]  %s509_s12, 256, %s931_s8, [#allocation4], %s792_s6, %s792_s6, %s793_s7   ;;  %v494_v29 = vmax.f32 %v491_v28, 1.0 }
 0x380   :  { %692 = vrcp.f32 %v494_v29 }
 0x381   :  { %v493_v30 = vpop.xlane.xlu1 %492 }
 0x382   :  { %v495_v31 = vmax.f32 %v493_v30, 1.0 }
 0x384   :  { %694 = vrcp.f32 %v495_v31 }
 0x38d   :  { %v693_v32 = vpop.eup %692 }
 0x391   :  { %v695_v35 = vpop.eup %694 }
 0x399   :  { %v487_v33 = vpop.xlane.xlu1 %486 }
 0x39a   :  { %v497_v34 = vmul.f32 %v693_v32, %v487_v33 }
 0x39c   :  { %501 = vst.msk [vmem:[%s932_s9] sm:$0xff] %vm500_vm7, %v497_v34 }
 0x39d   :  { %v489_v36 = vpop.xlane.xlu1 %488 }
 0x39e   :  { %v499_v37 = vmul.f32 %v695_v35, %v489_v36 }
 0x3a0   :  { %502 = vst.msk [vmem:[%s932_s9 + $0x8] sm:$0xff] %vm500_vm7, %v499_v37 }
 0x3a1   :  { %780 = dma.done.wait [#allocation4], 256  }
 0x3a2   :  { %781 = vsyncadd [#allocation4], 4294967040 }
 0x3a3   :  { %522 = vsyncpa [#allocation3], 1 }
 0x3a4   :  { %523 = vsyncpa [#allocation6], 1 }
 0x3a5   :  { %524 = vsyncpa [#allocation4], 1 }

</bundles_post_ra>
